<compile_context>
chip_gen: v7x
topology: tpu7x:2x2x1
jax: 0.10.0
libtpu: 0.0.40
codegen_flags: <defaults>
</compile_context>

<pallas_src>
import functools

import jax
import jax.numpy as jnp
from jax import lax
from jax.experimental import pallas as pl
from jax.experimental.pallas import tpu as pltpu


def _round_up(n, m):
    return ((n + m - 1) // m) * m


# ---------------------------------------------------------------------------
# Kernel 1: attentive statistics pooling (online softmax over time)
# ---------------------------------------------------------------------------
def _astp_kernel(x_ref, w1_ref, b1_ref, w2_ref, b2_ref, out_ref,
                 m_run, l_run, s1_run, s2_run, *, t_valid, tile_t):
    # x_ref:   (Bb, Tt, Cp)  activations, f32 or bf16
    # w1_ref:  (Cp, Dp)      conv1 weight^T (x dtype), b1_ref: (1, Dp) f32
    # w2_ref:  (Dp, Cp)      conv2 weight^T (x dtype), b2_ref: (1, Cp) f32
    # out_ref: (Bb, 2, Cp)   [mu ; sg], written once on the last T tile
    # scratch: 4 x (Bb, 1, Cp) f32 : running max, denom, sum(x*e), sum(x^2*e)
    t = pl.program_id(1)
    nt = pl.num_programs(1)

    @pl.when(t == 0)
    def _init():
        m_run[...] = jnp.full_like(m_run, -jnp.inf)
        l_run[...] = jnp.zeros_like(l_run)
        s1_run[...] = jnp.zeros_like(s1_run)
        s2_run[...] = jnp.zeros_like(s2_run)

    x = x_ref[...]                                        # (Bb, Tt, Cp)
    bb, tt, cp = x.shape
    xm = x.reshape(bb * tt, cp)                           # fold batch into matmul M

    # attention MLP: two k=1 convs == per-frame linears on the MXU
    h = jnp.tanh(
        jnp.dot(xm, w1_ref[...], preferred_element_type=jnp.float32) + b1_ref[...]
    )                                                     # (Bb*Tt, Dp) f32
    logits = (
        jnp.dot(h.astype(x.dtype), w2_ref[...], preferred_element_type=jnp.float32)
        + b2_ref[...]
    ).reshape(bb, tt, cp)                                 # (Bb, Tt, Cp) f32

    # mask padded time rows (code only emitted when T % tile_t != 0)
    if t_valid is not None:
        row = t * tile_t + lax.broadcasted_iota(jnp.int32, (bb, tt, cp), 1)
        logits = jnp.where(row < t_valid, logits, jnp.float32(-1e30))

    # online softmax over the time axis, per (batch, channel)
    tile_max = jnp.max(logits, axis=1, keepdims=True)     # (Bb, 1, Cp)
    m_new = jnp.maximum(m_run[...], tile_max)
    alpha = jnp.exp(m_run[...] - m_new)
    e = jnp.exp(logits - m_new)                           # (Bb, Tt, Cp)

    xf = x.astype(jnp.float32)
    xe = xf * e                                           # reused for mu and E[x^2]
    l_run[...] = alpha * l_run[...] + jnp.sum(e, axis=1, keepdims=True)
    s1_run[...] = alpha * s1_run[...] + jnp.sum(xe, axis=1, keepdims=True)
    s2_run[...] = alpha * s2_run[...] + jnp.sum(xf * xe, axis=1, keepdims=True)
    m_run[...] = m_new

    @pl.when(t == nt - 1)
    def _finalize():
        inv_l = pl.reciprocal(l_run[...], approx=False)   # one (Bb,1,Cp) recip total
        mu = s1_run[...] * inv_l
        ex2 = s2_run[...] * inv_l
        sg = jnp.sqrt(jnp.maximum(ex2 - mu * mu, 1e-5))
        # two lane-dense slice stores (no lane-axis concat)
        out_ref[:, 0:1, :] = mu.astype(out_ref.dtype)
        out_ref[:, 1:2, :] = sg.astype(out_ref.dtype)


def astp_pallas(x_btc, w1, b1, w2, b2, *, tile_t=32, batch_block=4,
                vmem_limit_bytes=32 * 1024 * 1024):
    """Attentive statistics pooling.

    x_btc: (B, T, C) activations, channels last (producer emits this layout directly,
           so there is no HBM-side NCT->NTC transpose).  f32 or bf16.
    w1: (D, C) conv1 weight (k=1, squeezed), b1: (D,)
    w2: (C, D) conv2 weight (k=1, squeezed), b2: (C,)
    returns: (B, 2C) f32 == concat([mu, sg], dim=1), matching the PyTorch module.
    """
    B, T, C = x_btc.shape
    D = w1.shape[0]

    Cp = _round_up(C, 128)
    Dp = _round_up(D, 128)
    Bb = min(batch_block, B)
    Bp = _round_up(B, Bb)
    Tt = min(_round_up(tile_t, 8), _round_up(T, 8))
    Tp = _round_up(T, Tt)

    # pad only if needed (no-op at production shapes: C = 256*11 = 22*128, D = 128)
    if (Bp, Tp, Cp) != (B, T, C):
        x_btc = jnp.pad(x_btc, ((0, Bp - B), (0, Tp - T), (0, Cp - C)))
    w1t = jnp.pad(jnp.transpose(w1), ((0, Cp - C), (0, Dp - D))).astype(x_btc.dtype)
    w2t = jnp.pad(jnp.transpose(w2), ((0, Dp - D), (0, Cp - C))).astype(x_btc.dtype)
    b1r = jnp.pad(b1, (0, Dp - D)).reshape(1, Dp).astype(jnp.float32)
    b2r = jnp.pad(b2, (0, Cp - C)).reshape(1, Cp).astype(jnp.float32)

    kernel = functools.partial(
        _astp_kernel,
        t_valid=(T if Tp != T else None),
        tile_t=Tt,
    )

    out = pl.pallas_call(
        kernel,
        out_shape=jax.ShapeDtypeStruct((Bp, 2, Cp), jnp.float32),
        grid_spec=pltpu.PrefetchScalarGridSpec(
            num_scalar_prefetch=0,
            grid=(Bp // Bb, Tp // Tt),
            in_specs=[
                pl.BlockSpec((Bb, Tt, Cp), lambda b, t: (b, t, 0)),  # x tile
                pl.BlockSpec((Cp, Dp), lambda b, t: (0, 0)),         # W1^T (resident)
                pl.BlockSpec((1, Dp), lambda b, t: (0, 0)),          # b1
                pl.BlockSpec((Dp, Cp), lambda b, t: (0, 0)),         # W2^T (resident)
                pl.BlockSpec((1, Cp), lambda b, t: (0, 0)),          # b2
            ],
            out_specs=pl.BlockSpec((Bb, 2, Cp), lambda b, t: (b, 0, 0)),
            scratch_shapes=[pltpu.VMEM((Bb, 1, Cp), jnp.float32)] * 4,
        ),
        compiler_params=pltpu.CompilerParams(
            dimension_semantics=("parallel", "arbitrary"),
            vmem_limit_bytes=vmem_limit_bytes,
        ),
    )(x_btc, w1t, b1r, w2t, b2r)

    # (B, 2, C) -> (B, 2C) keeps the [mu | sg] ordering of torch.cat(dim=1)
    return out[:B, :, :C].reshape(B, 2 * C)


# ---------------------------------------------------------------------------
# Kernel 2: BN-folded fc_embed + L2 normalize + AMSM cosine logits (label=None)
# ---------------------------------------------------------------------------
def _head_kernel(s_ref, at_ref, c_ref, wnt_ref, out_ref, e_scr):
    # s_ref:   (Bp, F2p)  pooled stats (BN1 folded into at/c)
    # at_ref:  (F2p, Ep)  folded fc_embed weight^T (BN1 + BN2 absorbed)
    # c_ref:   (1, Ep)    folded bias
    # wnt_ref: (Ep, Nt)   row-normalized AMSM weight^T, one class tile
    # out_ref: (Bp, Nt)   cosine logits tile
    # e_scr:   (Bp, Ep)   L2-normalized embedding, computed once on the first tile
    @pl.when(pl.program_id(0) == 0)
    def _embed():
        e = jnp.dot(s_ref[...], at_ref[...],
                    preferred_element_type=jnp.float32) + c_ref[...]
        nrm = jnp.sqrt(jnp.sum(e * e, axis=-1, keepdims=True))
        e_scr[...] = e / jnp.maximum(nrm, 1e-12)          # F.normalize semantics

    out_ref[...] = jnp.dot(
        e_scr[...].astype(wnt_ref.dtype), wnt_ref[...],
        preferred_element_type=jnp.float32).astype(out_ref.dtype)


def embed_head_pallas(stats,
                      bn1_gamma, bn1_beta, bn1_mean, bn1_var,
                      fc_w, fc_b,
                      bn2_gamma, bn2_beta, bn2_mean, bn2_var,
                      amsm_w, *, tile_n=512, bn_eps=1e-5,
                      vmem_limit_bytes=32 * 1024 * 1024):
    """norm_stats -> fc_embed -> norm_embed -> AMSMLoss(label=None).

    stats:  (B, 2C) pooled statistics (output of astp_pallas)
    fc_w:   (E, 2C), fc_b: (E,)       -- fc_embed
    amsm_w: (N, E)                    -- AMSMLoss.W
    BN params are eval-mode running statistics; they are folded (host-side,
    parameter-sized work) into a single affine before the kernel.
    returns: (B, N) cosine logits.
    """
    B, F2 = stats.shape
    E = fc_w.shape[0]
    N = amsm_w.shape[0]

    # Fold BN1 into fc_embed and BN2 into the output affine:
    #   e = scale2 * (fc_w @ (scale1*s + shift1) + fc_b) + shift2 = A @ s + c
    scale1 = bn1_gamma / jnp.sqrt(bn1_var + bn_eps)
    shift1 = bn1_beta - bn1_mean * scale1
    scale2 = bn2_gamma / jnp.sqrt(bn2_var + bn_eps)
    shift2 = bn2_beta - bn2_mean * scale2
    a_mat = (fc_w * scale1[None, :]) * scale2[:, None]            # (E, 2C)
    c_vec = scale2 * (fc_w @ shift1 + fc_b) + shift2              # (E,)
    w_norm = amsm_w / jnp.maximum(
        jnp.sqrt(jnp.sum(amsm_w * amsm_w, axis=1, keepdims=True)), 1e-12)  # (N, E)

    Bp = _round_up(B, 8)
    F2p = _round_up(F2, 128)
    Ep = _round_up(E, 128)
    Nt = min(_round_up(tile_n, 128), _round_up(N, 128))
    Np = _round_up(N, Nt)

    s_p = jnp.pad(stats.astype(jnp.float32), ((0, Bp - B), (0, F2p - F2)))
    at_p = jnp.pad(jnp.transpose(a_mat), ((0, F2p - F2), (0, Ep - E))).astype(jnp.float32)
    c_p = jnp.pad(c_vec, (0, Ep - E)).reshape(1, Ep).astype(jnp.float32)
    wnt_p = jnp.pad(jnp.transpose(w_norm), ((0, Ep - E), (0, Np - N))).astype(jnp.float32)

    out = pl.pallas_call(
        _head_kernel,
        out_shape=jax.ShapeDtypeStruct((Bp, Np), jnp.float32),
        grid_spec=pltpu.PrefetchScalarGridSpec(
            num_scalar_prefetch=0,
            grid=(Np // Nt,),
            in_specs=[
                pl.BlockSpec((Bp, F2p), lambda n: (0, 0)),   # stats (resident)
                pl.BlockSpec((F2p, Ep), lambda n: (0, 0)),   # folded fc weight^T
                pl.BlockSpec((1, Ep), lambda n: (0, 0)),     # folded bias
                pl.BlockSpec((Ep, Nt), lambda n: (0, n)),    # normalized W^T tile
            ],
            out_specs=pl.BlockSpec((Bp, Nt), lambda n: (0, n)),
            scratch_shapes=[pltpu.VMEM((Bp, Ep), jnp.float32)],
        ),
        compiler_params=pltpu.CompilerParams(
            dimension_semantics=("arbitrary",),
            vmem_limit_bytes=vmem_limit_bytes,
        ),
    )(s_p, at_p, c_p, wnt_p)

    return out[:B, :N]


# ---------------------------------------------------------------------------
# Pure-JAX references (PyTorch semantics)
# ---------------------------------------------------------------------------
def astp_reference_nct(x_nct, w1, b1, w2, b2):
    h = jnp.einsum("bct,dc->bdt", x_nct, w1) + b1[None, :, None]
    h = jnp.tanh(h)
    logits = jnp.einsum("bdt,cd->bct", h, w2) + b2[None, :, None]
    w = jax.nn.softmax(logits, axis=2)
    mu = jnp.sum(x_nct * w, axis=2)
    sg = jnp.sqrt(jnp.clip(jnp.sum(x_nct * x_nct * w, axis=2) - mu * mu, 1e-5, None))
    return jnp.concatenate([mu, sg], axis=1)


def head_reference(stats, bn1, fc_w, fc_b, bn2, amsm_w, bn_eps=1e-5):
    g1, b1_, m1, v1 = bn1
    g2, b2_, m2, v2 = bn2
    s = (stats - m1) / jnp.sqrt(v1 + bn_eps) * g1 + b1_
    e = s @ fc_w.T + fc_b
    e = (e - m2) / jnp.sqrt(v2 + bn_eps) * g2 + b2_
    en = e / jnp.maximum(jnp.linalg.norm(e, axis=1, keepdims=True), 1e-12)
    wn = amsm_w / jnp.maximum(jnp.linalg.norm(amsm_w, axis=1, keepdims=True), 1e-12)
    return en @ wn.T


if __name__ == "__main__":
    # small stand-ins: C = flattened channels*freq, D = bottleneck (channels[3]//2),
    # E = embed_features, N = num_classes
    B, C, T = 3, 112, 40
    D, E, N = 24, 32, 64

    key = jax.random.PRNGKey(0)
    keys = jax.random.split(key, 16)

    # producer emits channels-last activations directly (no HBM transpose needed)
    x_btc = jax.random.normal(keys[0], (B, T, C), dtype=jnp.float32)
    w1 = jax.random.normal(keys[1], (D, C), dtype=jnp.float32) * 0.1   # conv1.weight[:, :, 0]
    b1 = jax.random.normal(keys[2], (D,), dtype=jnp.float32) * 0.1     # conv1.bias
    w2 = jax.random.normal(keys[3], (C, D), dtype=jnp.float32) * 0.1   # conv2.weight[:, :, 0]
    b2 = jax.random.normal(keys[4], (C,), dtype=jnp.float32) * 0.1     # conv2.bias

    # eval-mode BatchNorm1d params + fc_embed + AMSM weight
    bn1 = (1.0 + 0.1 * jax.random.normal(keys[5], (2 * C,)),
           0.1 * jax.random.normal(keys[6], (2 * C,)),
           0.1 * jax.random.normal(keys[7], (2 * C,)),
           1.0 + 0.1 * jax.random.uniform(keys[8], (2 * C,)))
    fc_w = jax.random.normal(keys[9], (E, 2 * C), dtype=jnp.float32) * 0.05
    fc_b = jax.random.normal(keys[10], (E,), dtype=jnp.float32) * 0.05
    bn2 = (1.0 + 0.1 * jax.random.normal(keys[11], (E,)),
           0.1 * jax.random.normal(keys[12], (E,)),
           0.1 * jax.random.normal(keys[13], (E,)),
           1.0 + 0.1 * jax.random.uniform(keys[14], (E,)))
    amsm_w = jax.random.normal(keys[15], (N, E), dtype=jnp.float32) * 0.1

    x_nct = jnp.transpose(x_btc, (0, 2, 1))   # PyTorch NCT view, reference only

    # --- attentive statistics pooling ---
    stats = jax.block_until_ready(astp_pallas(x_btc, w1, b1, w2, b2))
    stats_ref = jax.block_until_ready(astp_reference_nct(x_nct, w1, b1, w2, b2))
    assert stats.shape == (B, 2 * C), stats.shape
    assert jnp.allclose(stats, stats_ref, atol=1e-4, rtol=1e-4), (
        float(jnp.max(jnp.abs(stats - stats_ref))))

    # bf16 activation path (halves HBM traffic for x on v6e/v7x); looser tolerance.
    stats_bf16 = jax.block_until_ready(
        astp_pallas(x_btc.astype(jnp.bfloat16), w1, b1, w2, b2))
    assert jnp.allclose(stats_bf16, stats_ref, atol=1e-1, rtol=1e-1), (
        float(jnp.max(jnp.abs(stats_bf16 - stats_ref))))

    # --- BN + fc_embed + BN + AMSM cosine head ---
    logits = jax.block_until_ready(
        embed_head_pallas(stats, *bn1, fc_w, fc_b, *bn2, amsm_w))
    logits_ref = jax.block_until_ready(
        head_reference(stats_ref, bn1, fc_w, fc_b, bn2, amsm_w))
    assert logits.shape == (B, N), logits.shape
    assert jnp.allclose(logits, logits_ref, atol=1e-3, rtol=1e-3), (
        float(jnp.max(jnp.abs(logits - logits_ref))))

    print("KERNEL_OK")
</pallas_src>

<mosaic_0001>
module attributes {stable_mosaic.version = 11 : i64} {
  func.func @_astp_kernel(%arg0: i32, %arg1: i32, %arg2: memref<3x32x128xf32, #tpu.memory_space<vmem>>, %arg3: memref<128x128xf32, #tpu.memory_space<vmem>>, %arg4: memref<1x128xf32, #tpu.memory_space<vmem>>, %arg5: memref<128x128xf32, #tpu.memory_space<vmem>>, %arg6: memref<1x128xf32, #tpu.memory_space<vmem>>, %arg7: memref<3x2x128xf32, #tpu.memory_space<vmem>>, %arg8: memref<3x1x128xf32, #tpu.memory_space<vmem>>, %arg9: memref<3x1x128xf32, #tpu.memory_space<vmem>>, %arg10: memref<3x1x128xf32, #tpu.memory_space<vmem>>, %arg11: memref<3x1x128xf32, #tpu.memory_space<vmem>>) attributes {dimension_semantics = [#tpu.dimension_semantics<parallel>, #tpu.dimension_semantics<arbitrary>], iteration_bounds = array<i64: 1, 2>, scalar_prefetch = 0 : i64, scratch_operands = 4 : i64, tpu.core_type = #tpu.core_type<tc>, window_params = [{transform_indices = @transform_0, window_bounds = array<i64: 3, 32, 128>}, {pipeline_mode = #tpu.pipeline_mode<synchronous>, transform_indices = @transform_1, window_bounds = array<i64: 128, 128>}, {pipeline_mode = #tpu.pipeline_mode<synchronous>, transform_indices = @transform_2, window_bounds = array<i64: 1, 128>}, {pipeline_mode = #tpu.pipeline_mode<synchronous>, transform_indices = @transform_3, window_bounds = array<i64: 128, 128>}, {pipeline_mode = #tpu.pipeline_mode<synchronous>, transform_indices = @transform_4, window_bounds = array<i64: 1, 128>}, {transform_indices = @transform_5, window_bounds = array<i64: 3, 2, 128>}]} {
    %c0_i32 = arith.constant 0 : i32
    %0 = arith.cmpi eq, %arg1, %c0_i32 : i32
    %1 = arith.extui %0 : i1 to i32
    %c0_i32_0 = arith.constant 0 : i32
    %2 = arith.cmpi ne, %1, %c0_i32_0 : i32
    scf.if %2 {
      %cst_45 = arith.constant 0xFF800000 : f32
      %59 = vector.broadcast %cst_45 : f32 to vector<3x1x128xf32>
      %c0_46 = arith.constant 0 : index
      %c0_47 = arith.constant 0 : index
      %c0_48 = arith.constant 0 : index
      %60 = vector.load %arg8[%c0_46, %c0_47, %c0_48] : memref<3x1x128xf32, #tpu.memory_space<vmem>>, vector<3x1x128xf32>
      tpu.vector_store %arg8[%c0_46, %c0_47, %c0_48], %59 {strides = array<i32>} : memref<3x1x128xf32, #tpu.memory_space<vmem>>, vector<3x1x128xf32>,
      %cst_49 = arith.constant 0.000000e+00 : f32
      %61 = vector.broadcast %cst_49 : f32 to vector<3x1x128xf32>
      %c0_50 = arith.constant 0 : index
      %c0_51 = arith.constant 0 : index
      %c0_52 = arith.constant 0 : index
      %62 = vector.load %arg9[%c0_50, %c0_51, %c0_52] : memref<3x1x128xf32, #tpu.memory_space<vmem>>, vector<3x1x128xf32>
      tpu.vector_store %arg9[%c0_50, %c0_51, %c0_52], %61 {strides = array<i32>} : memref<3x1x128xf32, #tpu.memory_space<vmem>>, vector<3x1x128xf32>,
      %cst_53 = arith.constant 0.000000e+00 : f32
      %63 = vector.broadcast %cst_53 : f32 to vector<3x1x128xf32>
      %c0_54 = arith.constant 0 : index
      %c0_55 = arith.constant 0 : index
      %c0_56 = arith.constant 0 : index
      %64 = vector.load %arg10[%c0_54, %c0_55, %c0_56] : memref<3x1x128xf32, #tpu.memory_space<vmem>>, vector<3x1x128xf32>
      tpu.vector_store %arg10[%c0_54, %c0_55, %c0_56], %63 {strides = array<i32>} : memref<3x1x128xf32, #tpu.memory_space<vmem>>, vector<3x1x128xf32>,
      %cst_57 = arith.constant 0.000000e+00 : f32
      %65 = vector.broadcast %cst_57 : f32 to vector<3x1x128xf32>
      %c0_58 = arith.constant 0 : index
      %c0_59 = arith.constant 0 : index
      %c0_60 = arith.constant 0 : index
      %66 = vector.load %arg11[%c0_58, %c0_59, %c0_60] : memref<3x1x128xf32, #tpu.memory_space<vmem>>, vector<3x1x128xf32>
      tpu.vector_store %arg11[%c0_58, %c0_59, %c0_60], %65 {strides = array<i32>} : memref<3x1x128xf32, #tpu.memory_space<vmem>>, vector<3x1x128xf32>,
    } else {
    }
    %c0 = arith.constant 0 : index
    %c0_1 = arith.constant 0 : index
    %c0_2 = arith.constant 0 : index
    %3 = vector.load %arg2[%c0, %c0_1, %c0_2] : memref<3x32x128xf32, #tpu.memory_space<vmem>>, vector<3x32x128xf32>
    %4 = vector.shape_cast %3 : vector<3x32x128xf32> to vector<96x128xf32>
    %c0_3 = arith.constant 0 : index
    %c0_4 = arith.constant 0 : index
    %5 = vector.load %arg3[%c0_3, %c0_4] : memref<128x128xf32, #tpu.memory_space<vmem>>, vector<128x128xf32>
    %cst = arith.constant dense<0.000000e+00> : vector<96x128xf32>
    %6 = tpu.matmul %4, %5, %cst {dimension_numbers = #tpu.dot_dimension_numbers<[1], [0], [0], [1], [0, 0, 1, 1], [], []>} : vector<96x128xf32>, vector<128x128xf32>, vector<96x128xf32> -> vector<96x128xf32>
    %c0_5 = arith.constant 0 : index
    %c0_6 = arith.constant 0 : index
    %7 = vector.load %arg4[%c0_5, %c0_6] : memref<1x128xf32, #tpu.memory_space<vmem>>, vector<1x128xf32>
    %8 = vector.broadcast %7 : vector<1x128xf32> to vector<96x128xf32>
    %9 = arith.addf %6, %8 : vector<96x128xf32>
    %10 = math.tanh %9 : vector<96x128xf32>
    %c0_7 = arith.constant 0 : index
    %c0_8 = arith.constant 0 : index
    %11 = vector.load %arg5[%c0_7, %c0_8] : memref<128x128xf32, #tpu.memory_space<vmem>>, vector<128x128xf32>
    %cst_9 = arith.constant dense<0.000000e+00> : vector<96x128xf32>
    %12 = tpu.matmul %10, %11, %cst_9 {dimension_numbers = #tpu.dot_dimension_numbers<[1], [0], [0], [1], [0, 0, 1, 1], [], []>} : vector<96x128xf32>, vector<128x128xf32>, vector<96x128xf32> -> vector<96x128xf32>
    %c0_10 = arith.constant 0 : index
    %c0_11 = arith.constant 0 : index
    %13 = vector.load %arg6[%c0_10, %c0_11] : memref<1x128xf32, #tpu.memory_space<vmem>>, vector<1x128xf32>
    %14 = vector.broadcast %13 : vector<1x128xf32> to vector<96x128xf32>
    %15 = arith.addf %12, %14 : vector<96x128xf32>
    %16 = vector.shape_cast %15 : vector<96x128xf32> to vector<3x32x128xf32>
    %c32_i32 = arith.constant 32 : i32
    %17 = arith.muli %arg1, %c32_i32 : i32
    %18 = tpu.iota {dimensions = array<i32: 1>} : vector<3x32x128xi32>
    %19 = vector.broadcast %17 : i32 to vector<3x32x128xi32>
    %20 = arith.addi %19, %18 : vector<3x32x128xi32>
    %c40_i32 = arith.constant 40 : i32
    %21 = vector.broadcast %c40_i32 : i32 to vector<3x32x128xi32>
    %22 = arith.cmpi slt, %20, %21 : vector<3x32x128xi32>
    %cst_12 = arith.constant -1.000000e+30 : f32
    %23 = vector.broadcast %cst_12 : f32 to vector<3x32x128xf32>
    %24 = arith.select %22, %16, %23 : vector<3x32x128xi1>, vector<3x32x128xf32>
    %cst_13 = arith.constant dense<0xFF800000> : vector<3x128xf32>
    %25 = vector.multi_reduction <maximumf>, %24, %cst_13 [1] : vector<3x32x128xf32> to vector<3x128xf32>
    %26 = vector.shape_cast %25 : vector<3x128xf32> to vector<3x1x128xf32>
    %c0_14 = arith.constant 0 : index
    %c0_15 = arith.constant 0 : index
    %c0_16 = arith.constant 0 : index
    %27 = vector.load %arg8[%c0_14, %c0_15, %c0_16] : memref<3x1x128xf32, #tpu.memory_space<vmem>>, vector<3x1x128xf32>
    %28 = arith.maximumf %27, %26 : vector<3x1x128xf32>
    %c0_17 = arith.constant 0 : index
    %c0_18 = arith.constant 0 : index
    %c0_19 = arith.constant 0 : index
    %29 = vector.load %arg8[%c0_17, %c0_18, %c0_19] : memref<3x1x128xf32, #tpu.memory_space<vmem>>, vector<3x1x128xf32>
    %30 = arith.subf %29, %28 : vector<3x1x128xf32>
    %31 = math.exp %30 : vector<3x1x128xf32>
    %32 = vector.broadcast %28 : vector<3x1x128xf32> to vector<3x32x128xf32>
    %33 = arith.subf %24, %32 : vector<3x32x128xf32>
    %34 = math.exp %33 : vector<3x32x128xf32>
    %35 = arith.mulf %3, %34 : vector<3x32x128xf32>
    %c0_20 = arith.constant 0 : index
    %c0_21 = arith.constant 0 : index
    %c0_22 = arith.constant 0 : index
    %36 = vector.load %arg9[%c0_20, %c0_21, %c0_22] : memref<3x1x128xf32, #tpu.memory_space<vmem>>, vector<3x1x128xf32>
    %37 = arith.mulf %31, %36 : vector<3x1x128xf32>
    %cst_23 = arith.constant dense<0.000000e+00> : vector<3x128xf32>
    %38 = vector.multi_reduction <add>, %34, %cst_23 [1] : vector<3x32x128xf32> to vector<3x128xf32>
    %39 = vector.shape_cast %38 : vector<3x128xf32> to vector<3x1x128xf32>
    %40 = arith.addf %37, %39 : vector<3x1x128xf32>
    %c0_24 = arith.constant 0 : index
    %c0_25 = arith.constant 0 : index
    %c0_26 = arith.constant 0 : index
    %41 = vector.load %arg9[%c0_24, %c0_25, %c0_26] : memref<3x1x128xf32, #tpu.memory_space<vmem>>, vector<3x1x128xf32>
    tpu.vector_store %arg9[%c0_24, %c0_25, %c0_26], %40 {strides = array<i32>} : memref<3x1x128xf32, #tpu.memory_space<vmem>>, vector<3x1x128xf32>,
    %c0_27 = arith.constant 0 : index
    %c0_28 = arith.constant 0 : index
    %c0_29 = arith.constant 0 : index
    %42 = vector.load %arg10[%c0_27, %c0_28, %c0_29] : memref<3x1x128xf32, #tpu.memory_space<vmem>>, vector<3x1x128xf32>
    %43 = arith.mulf %31, %42 : vector<3x1x128xf32>
    %cst_30 = arith.constant dense<0.000000e+00> : vector<3x128xf32>
    %44 = vector.multi_reduction <add>, %35, %cst_30 [1] : vector<3x32x128xf32> to vector<3x128xf32>
    %45 = vector.shape_cast %44 : vector<3x128xf32> to vector<3x1x128xf32>
    %46 = arith.addf %43, %45 : vector<3x1x128xf32>
    %c0_31 = arith.constant 0 : index
    %c0_32 = arith.constant 0 : index
    %c0_33 = arith.constant 0 : index
    %47 = vector.load %arg10[%c0_31, %c0_32, %c0_33] : memref<3x1x128xf32, #tpu.memory_space<vmem>>, vector<3x1x128xf32>
    tpu.vector_store %arg10[%c0_31, %c0_32, %c0_33], %46 {strides = array<i32>} : memref<3x1x128xf32, #tpu.memory_space<vmem>>, vector<3x1x128xf32>,
    %c0_34 = arith.constant 0 : index
    %c0_35 = arith.constant 0 : index
    %c0_36 = arith.constant 0 : index
    %48 = vector.load %arg11[%c0_34, %c0_35, %c0_36] : memref<3x1x128xf32, #tpu.memory_space<vmem>>, vector<3x1x128xf32>
    %49 = arith.mulf %31, %48 : vector<3x1x128xf32>
    %50 = arith.mulf %3, %35 : vector<3x32x128xf32>
    %cst_37 = arith.constant dense<0.000000e+00> : vector<3x128xf32>
    %51 = vector.multi_reduction <add>, %50, %cst_37 [1] : vector<3x32x128xf32> to vector<3x128xf32>
    %52 = vector.shape_cast %51 : vector<3x128xf32> to vector<3x1x128xf32>
    %53 = arith.addf %49, %52 : vector<3x1x128xf32>
    %c0_38 = arith.constant 0 : index
    %c0_39 = arith.constant 0 : index
    %c0_40 = arith.constant 0 : index
    %54 = vector.load %arg11[%c0_38, %c0_39, %c0_40] : memref<3x1x128xf32, #tpu.memory_space<vmem>>, vector<3x1x128xf32>
    tpu.vector_store %arg11[%c0_38, %c0_39, %c0_40], %53 {strides = array<i32>} : memref<3x1x128xf32, #tpu.memory_space<vmem>>, vector<3x1x128xf32>,
    %c0_41 = arith.constant 0 : index
    %c0_42 = arith.constant 0 : index
    %c0_43 = arith.constant 0 : index
    %55 = vector.load %arg8[%c0_41, %c0_42, %c0_43] : memref<3x1x128xf32, #tpu.memory_space<vmem>>, vector<3x1x128xf32>
    tpu.vector_store %arg8[%c0_41, %c0_42, %c0_43], %28 {strides = array<i32>} : memref<3x1x128xf32, #tpu.memory_space<vmem>>, vector<3x1x128xf32>,
    %c1_i32 = arith.constant 1 : i32
    %56 = arith.cmpi eq, %arg1, %c1_i32 : i32
    %57 = arith.extui %56 : i1 to i32
    %c0_i32_44 = arith.constant 0 : i32
    %58 = arith.cmpi ne, %57, %c0_i32_44 : i32
    scf.if %58 {
      %c0_45 = arith.constant 0 : index
      %c0_46 = arith.constant 0 : index
      %c0_47 = arith.constant 0 : index
      %59 = vector.load %arg9[%c0_45, %c0_46, %c0_47] : memref<3x1x128xf32, #tpu.memory_space<vmem>>, vector<3x1x128xf32>
      %60 = tpu.reciprocal %59 : vector<3x1x128xf32> -> vector<3x1x128xf32>
      %c0_48 = arith.constant 0 : index
      %c0_49 = arith.constant 0 : index
      %c0_50 = arith.constant 0 : index
      %61 = vector.load %arg10[%c0_48, %c0_49, %c0_50] : memref<3x1x128xf32, #tpu.memory_space<vmem>>, vector<3x1x128xf32>
      %62 = arith.mulf %61, %60 : vector<3x1x128xf32>
      %c0_51 = arith.constant 0 : index
      %c0_52 = arith.constant 0 : index
      %c0_53 = arith.constant 0 : index
      %63 = vector.load %arg11[%c0_51, %c0_52, %c0_53] : memref<3x1x128xf32, #tpu.memory_space<vmem>>, vector<3x1x128xf32>
      %64 = arith.mulf %63, %60 : vector<3x1x128xf32>
      %65 = arith.mulf %62, %62 : vector<3x1x128xf32>
      %66 = arith.subf %64, %65 : vector<3x1x128xf32>
      %cst_54 = arith.constant 9.99999974E-6 : f32
      %67 = vector.broadcast %cst_54 : f32 to vector<3x1x128xf32>
      %68 = arith.maximumf %66, %67 : vector<3x1x128xf32>
      %69 = math.sqrt %68 : vector<3x1x128xf32>
      %c0_55 = arith.constant 0 : index
      %c0_56 = arith.constant 0 : index
      %c0_57 = arith.constant 0 : index
      %70 = vector.load %arg7[%c0_55, %c0_56, %c0_57] : memref<3x2x128xf32, #tpu.memory_space<vmem>>, vector<3x1x128xf32>
      tpu.vector_store %arg7[%c0_55, %c0_56, %c0_57], %62 {strides = array<i32>} : memref<3x2x128xf32, #tpu.memory_space<vmem>>, vector<3x1x128xf32>,
      %c0_58 = arith.constant 0 : index
      %c1 = arith.constant 1 : index
      %c0_59 = arith.constant 0 : index
      %71 = vector.load %arg7[%c0_58, %c1, %c0_59] : memref<3x2x128xf32, #tpu.memory_space<vmem>>, vector<3x1x128xf32>
      tpu.vector_store %arg7[%c0_58, %c1, %c0_59], %69 {strides = array<i32>} : memref<3x2x128xf32, #tpu.memory_space<vmem>>, vector<3x1x128xf32>,
    } else {
    }
    return
  }
  func.func @transform_0(%arg0: i32, %arg1: i32) -> (i32, i32, i32) {
    %c0_i32 = arith.constant 0 : i32
    %c0_i32_0 = arith.constant 0 : i32
    return %arg0, %arg1, %c0_i32 : i32, i32, i32
  }
  func.func @transform_1(%arg0: i32, %arg1: i32) -> (i32, i32) {
    %c0_i32 = arith.constant 0 : i32
    %c0_i32_0 = arith.constant 0 : i32
    %c0_i32_1 = arith.constant 0 : i32
    return %c0_i32, %c0_i32_0 : i32, i32
  }
  func.func @transform_2(%arg0: i32, %arg1: i32) -> (i32, i32) {
    %c0_i32 = arith.constant 0 : i32
    %c0_i32_0 = arith.constant 0 : i32
    %c0_i32_1 = arith.constant 0 : i32
    return %c0_i32, %c0_i32_0 : i32, i32
  }
  func.func @transform_3(%arg0: i32, %arg1: i32) -> (i32, i32) {
    %c0_i32 = arith.constant 0 : i32
    %c0_i32_0 = arith.constant 0 : i32
    %c0_i32_1 = arith.constant 0 : i32
    return %c0_i32, %c0_i32_0 : i32, i32
  }
  func.func @transform_4(%arg0: i32, %arg1: i32) -> (i32, i32) {
    %c0_i32 = arith.constant 0 : i32
    %c0_i32_0 = arith.constant 0 : i32
    %c0_i32_1 = arith.constant 0 : i32
    return %c0_i32, %c0_i32_0 : i32, i32
  }
  func.func @transform_5(%arg0: i32, %arg1: i32) -> (i32, i32, i32) {
    %c0_i32 = arith.constant 0 : i32
    %c0_i32_0 = arith.constant 0 : i32
    %c0_i32_1 = arith.constant 0 : i32
    return %arg0, %c0_i32, %c0_i32_0 : i32, i32, i32
  }
}

</mosaic_0001>

<bundles_post_ra>
// kernel: tpu_custom_call.1
= control target key start
LH: loop header
LB: loop body
LE: loop exit
PB: predicated region body
PF: predicated region fallthrough
CT: control target
= control target key end

     0   :  { %10 = vsyncpa [#allocation7], 0  ;;  %s2012_s0 = inlined_call_operand.hbm [shape: f32[3,64,128], index: 0, kind: input, shape index: {}]   ;;  %s2013_s1 = inlined_call_operand.hbm [shape: f32[128,128], index: 1, kind: input, shape index: {}]   ;;  %s2014_s2 = inlined_call_operand.vmem [shape: f32[1,128], index: 2, kind: input, shape index: {}]   ;;  %s2015_s3 = inlined_call_operand.hbm [shape: f32[128,128], index: 3, kind: input, shape index: {}]   ;;  %s2016_s4 = inlined_call_operand.vmem [shape: f32[1,128], index: 4, kind: input, shape index: {}]   ;;  %s2017_s5 = inlined_call_operand.hbm [shape: f32[3,2,128], index: 5, kind: output, shape index: {}]  }
   0x1   :  { %12 = vsyncpa [#allocation7 + $0x1], 0 }
   0x2   :  { %13 = vsyncpa [#allocation10], 0 }
   0x3   :  { %14 = vsyncpa [#allocation8], 0  ;;  %s1660_s18 = smov 0   ;;  %s1662_s19 = smov 0  }
   0x4   :  { %s1664_s20 = smov 0   ;;  %s1666_s21 = smov 0  }
   0x5   :  { %s1668_s22 = smov 0   ;;  %s1670_s23 = smov 0  }
   0x6 LB: > { %s2023_s24 = sadd.s32 4294967295, %s1613_s23   ;;  %s29_s25 = sadd.s32 1, %s1609_s22  ;;  %s1613_s23 = sphi %s1670_s23, %s20_s23   ;;  %s1609_s22 = sphi %s1668_s22, %s2039_s22   ;;  %s1605_s21 = sphi %s1666_s21, %s2038_s21   ;;  %s1601_s20 = sphi %s1664_s20, %s2037_s20   ;;  %s1597_s19 = sphi %s1662_s19, %s2036_s19   ;;  %s1593_s18 = sphi %s1660_s18, %s2035_s18  }
   0x7   : > { %p30_p0 = scmp.ge.s32.totalorder %s29_s25, 2  ;;  %s41_s26 = sadd.s32 1, %s1601_s20 }
   0x8   : > { %p48_p1 = scmp.ne.s32.totalorder %s1601_s20, %s1597_s19  ;;  %p49_p2 = scmp.eq.s32.totalorder %s1613_s23, 0 }
   0x9   : > { %s2041_s25 = smov (%p30_p0, %s29_s25), 0  ;;  %p54_p4 = scmp.ne.s32.totalorder %s1597_s19, %s1593_s18 }
   0xa   : > { %p1696_p3 = por %p49_p2, %p48_p1  ;;  %s37_s28 = ssub.s32 %s1609_s22, %s2041_s25 }
   0xb   : > { %p1705_p5 = scmp.eq.s32.totalorder %s2023_s24, 0  ;;  %p39_p6 = scmp.eq.s32.totalorder %s37_s28, 0 }
   0xc   : > { %s2024_s27 = scalar_select %p1696_p3, 1, 0 }
   0xd   : > { %s2025_s29 = scalar_select %p1705_p5, 1, 0 }
   0xe   : > { %p1067_p7 = scmp.ge.s32.totalorder %s1613_s23, 1  ;;  %p1712_p8 = por %p1705_p5, %p54_p4 }
   0xf   : > { %p175_p9 = scmp.lt.s32.totalorder %s1613_s23, 3  ;;  %s1615_s8 = smov [#allocation9]  }
  0x10   : > { %s2026_s30 = scalar_select %p1712_p8, 1, 0 }
  0x11   : > { %s1718_s6 = scalar_select %p39_p6, %s1601_s20, %s41_s26  }
  0x12   : > { %p1720_p10 = pnand %p1067_p7, %p175_p9  ;;  %s187_s9 = sshll.u32 %s1615_s8, 4  ;;  %s188_s9 = int_to_ptr.vmem [resolvable:$true] %s187_s9 }
  0x13   : > { %s1616_s11 = smov [#allocation11]   ;;  %s1473_s15 = scalar_lea.hbm %s2013_s1, 2048 }
  0x14   : > { %s2027_s7 = scalar_select %p1720_p10, 1, 0 }
  0x15   : > { %p1331_p11 = pneg %p1720_p10  ;;  %s203_s12 = sshll.u32 %s1616_s11, 4  ;;  %s1732_s12 = int_to_ptr.vmem [resolvable:$true] %s203_s12 }
  0x16   : > { %p1474_p13 = scmp.ne.s32.totalorder %s2013_s1, %s1473_s15  ;;  %p1480_p4 = scmp.lt.u32.totalorder %s1473_s15, %s2013_s1 }
  0x17   : > { %p1728_p12 = pnand %p1331_p11, %p1705_p5 }
  0x19   : > { %p1475_p0 = pneg %p1728_p12 }
  0x1b   : > { %p1476_p1 = pnand %p1475_p0, %p1474_p13 }
  0x1d   : > { %p1477_p2 = pneg %p1476_p1 }
  0x1f   : > { %p1482_p6 = pnand %p1480_p4, %p1477_p2 }
  0x21   : > { %1485 = shalt.err (!%p1482_p6)
}
  0x22   : > { %s1486_s28 = scalar_lea.vmem %s188_s9, 2048  ;;  %p1494_p5 = scmp.lt.s32.totalorder %s188_s9, %s188_s9 }
  0x23   : > { %p1487_p7 = scmp.ne.s32.totalorder %s188_s9, %s1486_s28  ;;  %p1495_p8 = scmp.lt.s32.totalorder %s1486_s28, %s1486_s28 }
  0x25   : > { %p1489_p9 = pnand %p1487_p7, %p1475_p0  ;;  %p1496_p10 = por %p1495_p8, %p1494_p5 }
  0x27   : > { %p1490_p11 = pneg %p1489_p9 }
  0x29   : > { %p1497_p3 = pnand %p1496_p10, %p1490_p11 }
  0x2b   : > { %1500 = shalt.err (!%p1497_p3)
}
  0x2c   : > { %s1617_s8 = smov 128   ;;  %s1618_s11 = smov 8  }
  0x2d   : > { %1334 = dma.hbm_to_vmem [thread:$0]  (!%p1728_p12), %s2013_s1, 2048, %s188_s9, [#allocation10], %s1617_s8, %s1617_s8, %s1618_s11  }
  0x2e   : > { %s1501_s17 = scalar_lea.hbm %s2015_s3, 2048 }
  0x2f   : > { %p1502_p13 = scmp.ne.s32.totalorder %s2015_s3, %s1501_s17  ;;  %p1508_p8 = scmp.lt.u32.totalorder %s1501_s17, %s2015_s3 }
  0x31   : > { %p1504_p3 = pnand %p1502_p13, %p1475_p0 }
  0x33   : > { %p1505_p5 = pneg %p1504_p3 }
  0x35   : > { %p1510_p10 = pnand %p1508_p8, %p1505_p5 }
  0x37   : > { %1513 = shalt.err (!%p1510_p10)
}
  0x38   : > { %s1514_s9 = scalar_lea.vmem %s1732_s12, 2048  ;;  %p1522_p6 = scmp.lt.s32.totalorder %s1732_s12, %s1732_s12 }
  0x39   : > { %p1515_p1 = scmp.ne.s32.totalorder %s1732_s12, %s1514_s9  ;;  %p1523_p7 = scmp.lt.s32.totalorder %s1514_s9, %s1514_s9 }
  0x3b   : > { %p1517_p2 = pnand %p1515_p1, %p1475_p0  ;;  %p1524_p9 = por %p1523_p7, %p1522_p6 }
  0x3d   : > { %p1518_p4 = pneg %p1517_p2 }
  0x3f   : > { %p1525_p11 = pnand %p1524_p9, %p1518_p4 }
  0x41   : > { %1528 = shalt.err (!%p1525_p11)
}
  0x42   : > { %1337 = dma.hbm_to_vmem [thread:$0]  (!%p1728_p12), %s2015_s3, 2048, %s1732_s12, [#allocation10], %s1617_s8, %s1617_s8, %s1618_s11  }
  0x43   : > { %p1070_p13 = scmp.ge.s32.totalorder %s1613_s23, 2 }
  0x45   : > { %216 = sbr.rel (%p1070_p13) target bundleno = 92 (0x5c), region = 32 }
  0x4c   : > { %s220_s14 = sand.u32 1, %s1601_s20   ;;  %s1087_s16 = sshll.u32 %s1609_s22, 9 }
  0x4d   : > { %s1308_s15 = smul.u32 96, %s220_s14  ;;  %s1619_s10 = smov 1024  }
  0x4e   : > { %p2029_p0 = scmp.ne.s32.totalorder %s2024_s27, 0  ;;  %s233_s17 = scalar_lea.hbm %s2012_s0, %s1087_s16 }
  0x4f   : > { %s224_s26 = scalar_lea.vmem [#allocation6], %s1308_s15  ;;  %s1620_s9 = smov 512  }
  0x50   : > { %1315 = sst [smem:[#allocation14]] (%p2029_p0), %s1619_s10  ;;  %s246_s28 = sshll.u32 %s224_s26, 4  ;;  %s247_s28 = int_to_ptr.vmem [resolvable:$true] %s246_s28 }
  0x51   : > { %s1314_s12 = scalar_select %p2029_p0, [#allocation0], [#allocation15] }
  0x52   : > { %1316 = sst [smem:[#allocation14 + $0x1]] (%p2029_p0), %s1620_s9  ;;  %s1621_s24 = smov 4  }
  0x53   : > { %s238_s18 = sld [smem:[%s1314_s12]]   ;;  %s1622_s13 = smov 128  }
  0x54   : > { %1317 = sst [smem:[#allocation14 + $0x2]] (%p2029_p0), %s1621_s24  ;;  %s1623_s10 = smov 8  }
  0x55   : > { %1318 = sst [smem:[#allocation14 + $0x3]] (%p2029_p0), %s1622_s13  ;;  %s221_s15 = scalar_lea.sflag [#allocation7], %s220_s14 }
  0x56   : > { %1319 = sst [smem:[#allocation14 + $0x4]] (%p2029_p0), %s1622_s13  ;;  %s1624_s8 = smov [#allocation13]  }
  0x57   : > { %1320 = sst [smem:[#allocation14 + $0x5]] (%p2029_p0), %s1623_s10 }
  0x59   : > { %s1073_s16 = sshll.u32 %s238_s18, 26 }
  0x5a   : > { %s1074_s12 = sadd.s32 134217728, %s1073_s16 }
  0x5b   : > { %1321 = dma.general (%p2029_p0), %s233_s17, 1536, %s247_s28, %s221_s15, %s1624_s8, [#allocation14], %s1074_s12, 0  }
  0x5c PF: > { %p2030_p12 = scmp.ne.s32.totalorder %s2027_s7, 0 }
  0x5d   : > { %s273_s11 = sand.u32 (!%p2030_p12), 1, %s1597_s19   ;;  %p2031_p3 = scmp.ne.s32.totalorder (!%p2030_p12), %s2026_s30, 0 }
  0x5e   : > { %271 = sbr.rel (%p2030_p12) target bundleno = 745 (0x2e9), region = 40  ;;  %s274_s9 = scalar_lea.sflag (!%p2030_p12), [#allocation7], %s273_s11 }
  0x5f   : > { %s1309_s26 = smul.u32 (!%p2030_p12), 96, %s273_s11 }
  0x61   : > { %s1806_s24 = scalar_lea.vmem (!%p2030_p12), [#allocation6], %s1309_s26 }
  0x65   : > { %1580 = dma.done.wait (%p2031_p3), %s274_s9, 1536  }
  0x66   : > { %1582 = vsyncadd (%p2031_p3), %s274_s9, 4294965760  ;;  %p2032_p5 = scmp.ne.s32.totalorder %s2025_s29, 0 }
  0x68   : > { %1584 = dma.done.wait (%p2032_p5), [#allocation10], 4096  }
  0x69   : > { %1586 = vsyncadd (%p2032_p5), [#allocation10], 4294963200  ;;  %p1078_p8 = scmp.ne.s32.totalorder %s1605_s21, 0 }
  0x6a   : > { %v1625_v0 = vmov (!%p1078_p8), -inf   ;;  %v1626_v1 = vmov (!%p1078_p8), 0.0  }
  0x6b   : > { %313 = sbr.rel (%p1078_p8) target bundleno = 114 (0x72), region = 56  ;;  %314 = vst [vmem:[#allocation2] sm:$0x1] (!%p1078_p8), %v1625_v0  ;;  %315 = vst [vmem:[#allocation2 + $0x1] sm:$0x1] (!%p1078_p8), %v1625_v0 }
  0x6c   : > { %316 = vst [vmem:[#allocation2 + $0x2] sm:$0x1] (!%p1078_p8), %v1625_v0  ;;  %317 = vst [vmem:[#allocation3] sm:$0x1] (!%p1078_p8), %v1626_v1 }
  0x6d   : > { %318 = vst [vmem:[#allocation3 + $0x1] sm:$0x1] (!%p1078_p8), %v1626_v1  ;;  %319 = vst [vmem:[#allocation3 + $0x2] sm:$0x1] (!%p1078_p8), %v1626_v1 }
  0x6e   : > { %320 = vst [vmem:[#allocation4] sm:$0x1] (!%p1078_p8), %v1626_v1  ;;  %321 = vst [vmem:[#allocation4 + $0x1] sm:$0x1] (!%p1078_p8), %v1626_v1 }
  0x6f   : > { %322 = vst [vmem:[#allocation4 + $0x2] sm:$0x1] (!%p1078_p8), %v1626_v1  ;;  %323 = vst [vmem:[#allocation5] sm:$0x1] (!%p1078_p8), %v1626_v1 }
  0x70   : > { %324 = vst [vmem:[#allocation5 + $0x1] sm:$0x1] (!%p1078_p8), %v1626_v1  ;;  %325 = vst [vmem:[#allocation5 + $0x2] sm:$0x1] (!%p1078_p8), %v1626_v1 }
  0x72 PF: > { %v338_v2 = vld [vmem:[#allocation9] sm:$0xff]  ;;  %v339_v3 = vld [vmem:[#allocation9 + $0x8] sm:$0xff]  ;;  %v340_v4 = vld [vmem:[#allocation9 + $0x10] sm:$0xff]  ;;  %s1081_s30 = sshll.u32 %s1605_s21, 5  ;;  %p1082_p10 = scmp.ne.s32.totalorder %s1605_s21, 1 }
  0x73   : > { %v1244_v5 = vpack.c.bf16 %v339_v3, %v338_v2  ;;  %v341_v6 = vld [vmem:[#allocation9 + $0x18] sm:$0xff]  ;;  %v342_v8 = vld [vmem:[#allocation9 + $0x20] sm:$0xff]  ;;  %v343_v9 = vld [vmem:[#allocation9 + $0x28] sm:$0xff] }
  0x74   : > { %v1248_v7 = vpack.c.bf16 %v341_v6, %v340_v4  ;;  %v1252_v10 = vpack.c.bf16 %v343_v9, %v342_v8  ;;  %v1818_v11 = vld [vmem:[%s1806_s24] sm:$0xff]  ;;  %v344_v12 = vld [vmem:[#allocation9 + $0x30] sm:$0xff]  ;;  %v345_v13 = vld [vmem:[#allocation9 + $0x38] sm:$0xff] }
  0x75   : > { %1245 = vmatprep.subr.bf16.mxu0 %v1244_v5  ;;  %1176 = vmatprep.mubr.f32.mxu0 %v1818_v11  ;;  %v1256_v14 = vpack.c.bf16 %v345_v13, %v344_v12  ;;  %v346_v15 = vld [vmem:[#allocation9 + $0x40] sm:$0xff]  ;;  %v499_v17 = vld [vmem:[#allocation11 + $0x8] sm:$0xff]  ;;  %v500_v20 = vld [vmem:[#allocation11 + $0x10] sm:$0xff] }
  0x76   : > { %1247 = vmatpush3.bf16.msra.mxu0 %v1244_v5  ;;  %v498_v16 = vld [vmem:[#allocation11] sm:$0xff]  ;;  %v347_v18 = vld [vmem:[#allocation9 + $0x48] sm:$0xff]  ;;  %v501_v21 = vld [vmem:[#allocation11 + $0x18] sm:$0xff] }
  0x77   : > { %1249 = vmatprep.subr.bf16.mxu0 %v1248_v7  ;;  %v1276_v19 = vpack.c.bf16 %v499_v17, %v498_v16  ;;  %v1280_v22 = vpack.c.bf16 %v501_v21, %v500_v20  ;;  %v502_v23 = vld [vmem:[#allocation11 + $0x20] sm:$0xff]  ;;  %v503_v24 = vld [vmem:[#allocation11 + $0x28] sm:$0xff]  ;;  %v1260_v25 = vpack.c.bf16 %v347_v18, %v346_v15  ;;  %v348_v26 = vld [vmem:[#allocation9 + $0x50] sm:$0xff] }
  0x78   : > { %v349_v27 = vld [vmem:[#allocation9 + $0x58] sm:$0xff]  ;;  %v1284_v28 = vpack.c.bf16 %v503_v24, %v502_v23  ;;  %v504_v29 = vld [vmem:[#allocation11 + $0x30] sm:$0xff]  ;;  %v350_v32 = vld [vmem:[#allocation9 + $0x60] sm:$0xff] }
  0x79   : > { %1277 = vmatprep.subr.bf16.mxu1 %v1276_v19  ;;  %v505_v30 = vld [vmem:[#allocation11 + $0x38] sm:$0xff]  ;;  %v1264_v31 = vpack.c.bf16 %v349_v27, %v348_v26  ;;  %v351_v33 = vld [vmem:[#allocation9 + $0x68] sm:$0xff]  ;;  %v352_v36 = vld [vmem:[#allocation9 + $0x70] sm:$0xff] }
  0x7a   : > { %1251 = vmatpush3.bf16.msra.mxu0 %v1248_v7  ;;  %1279 = vmatpush3.bf16.msra.mxu1 %v1276_v19  ;;  %v1288_v34 = vpack.c.bf16 %v505_v30, %v504_v29  ;;  %v1268_v35 = vpack.c.bf16 %v351_v33, %v350_v32  ;;  %v353_v37 = vld [vmem:[#allocation9 + $0x78] sm:$0xff]  ;;  %v1822_v39 = vld [vmem:[%s1806_s24 + $0x8] sm:$0xff]  ;;  %v1825_v40 = vld [vmem:[%s1806_s24 + $0x10] sm:$0xff] }
  0x7b   : > { %1253 = vmatprep.subr.bf16.mxu0 %v1252_v10  ;;  %1281 = vmatprep.subr.bf16.mxu1 %v1280_v22  ;;  %v1272_v38 = vpack.c.bf16 %v353_v37, %v352_v36  ;;  %v1830_v41 = vld [vmem:[%s1806_s24 + $0x18] sm:$0xff]  ;;  %v1833_v42 = vld [vmem:[%s1806_s24 + $0x20] sm:$0xff]  ;;  %v1838_v43 = vld [vmem:[%s1806_s24 + $0x28] sm:$0xff]  ;;  %v647_v36 = vlaneseq }
  0x7c   : > { %v1841_v44 = vld [vmem:[%s1806_s24 + $0x30] sm:$0xff]  ;;  %v1846_v45 = vld [vmem:[%s1806_s24 + $0x38] sm:$0xff]  ;;  %v1849_v46 = vld [vmem:[%s1806_s24 + $0x40] sm:$0xff] }
  0x7d   : > { %v1854_v47 = vld [vmem:[%s1806_s24 + $0x48] sm:$0xff]  ;;  %v1857_v48 = vld [vmem:[%s1806_s24 + $0x50] sm:$0xff]  ;;  %v1862_v49 = vld [vmem:[%s1806_s24 + $0x58] sm:$0xff]  ;;  %v648_v37 = vshrl.u32 %v647_v36, 7 }
  0x7e   : > { %1255 = vmatpush3.bf16.msra.mxu0 %v1252_v10  ;;  %1283 = vmatpush3.bf16.msra.mxu1 %v1280_v22  ;;  %v506_v50 = vld [vmem:[#allocation11 + $0x40] sm:$0xff]  ;;  %v507_v51 = vld [vmem:[#allocation11 + $0x48] sm:$0xff]  ;;  %v508_v53 = vld [vmem:[#allocation11 + $0x50] sm:$0xff] }
  0x7f   : > { %1257 = vmatprep.subr.bf16.mxu0 %v1256_v14  ;;  %1285 = vmatprep.subr.bf16.mxu1 %v1284_v28  ;;  %v1292_v52 = vpack.c.bf16 %v507_v51, %v506_v50  ;;  %v509_v54 = vld [vmem:[#allocation11 + $0x58] sm:$0xff]  ;;  %v510_v56 = vld [vmem:[#allocation11 + $0x60] sm:$0xff]  ;;  %v511_v57 = vld [vmem:[#allocation11 + $0x68] sm:$0xff]  ;;  %v651_v50 = vadd.s32 24, %v648_v37  ;;  %v652_v51 = vstv %s1081_s30 }
  0x80   : > { %v1296_v55 = vpack.c.bf16 %v509_v54, %v508_v53  ;;  %v1300_v58 = vpack.c.bf16 %v511_v57, %v510_v56  ;;  %v512_v59 = vld [vmem:[#allocation11 + $0x70] sm:$0xff]  ;;  %v513_v60 = vld [vmem:[#allocation11 + $0x78] sm:$0xff] }
  0x81   : > { %v1304_v61 = vpack.c.bf16 %v513_v60, %v512_v59  ;;  %v1079_v62 = vld [vmem:[%s2014_s2] ss:$0 sm:$0xff]  ;;  %v656_v56 = vadd.s32 %v652_v51, %v651_v50 }
  0x82   : > { %1259 = vmatpush3.bf16.msra.mxu0 %v1256_v14  ;;  %1287 = vmatpush3.bf16.msra.mxu1 %v1284_v28  ;;  %v1080_v54 = vld [vmem:[%s2016_s4] ss:$0 sm:$0xff] }
  0x83   : > { %1261 = vmatprep.subr.bf16.mxu0 %v1260_v25  ;;  %1289 = vmatprep.subr.bf16.mxu1 %v1288_v34  ;;  %vm660_vm1 = vcmp.lt.s32.totalorder %v656_v56, 40  ;;  %v700_v50 = vld [vmem:[#allocation2] sm:$0x1] }
  0x86   : > { %1263 = vmatpush3.bf16.msra.mxu0 %v1260_v25  ;;  %1291 = vmatpush3.bf16.msra.mxu1 %v1288_v34 }
  0x87   : > { %1265 = vmatprep.subr.bf16.mxu0 %v1264_v31  ;;  %1293 = vmatprep.subr.bf16.mxu1 %v1292_v52 }
  0x8a   : > { %1267 = vmatpush3.bf16.msra.mxu0 %v1264_v31  ;;  %1295 = vmatpush3.bf16.msra.mxu1 %v1292_v52  ;;  %v650_v52 = vadd.s32 16, %v648_v37 }
  0x8b   : > { %1269 = vmatprep.subr.bf16.mxu0 %v1268_v35  ;;  %1297 = vmatprep.subr.bf16.mxu1 %v1296_v55 }
  0x8c   : > { %v655_v59 = vadd.s32 %v652_v51, %v650_v52 }
  0x8e   : > { %1271 = vmatpush3.bf16.msra.mxu0 %v1268_v35  ;;  %1299 = vmatpush3.bf16.msra.mxu1 %v1296_v55  ;;  %vm659_vm3 = vcmp.lt.s32.totalorder %v655_v59, 40 }
  0x8f   : > { %1273 = vmatprep.subr.bf16.mxu0 %v1272_v38  ;;  %1301 = vmatprep.subr.bf16.mxu1 %v1300_v58 }
  0x92   : > { %1275 = vmatpush3.bf16.msra.mxu0 %v1272_v38  ;;  %1303 = vmatpush3.bf16.msra.mxu1 %v1300_v58  ;;  %v649_v38 = vadd.s32 8, %v648_v37  ;;  %v653_v58 = vadd.s32 %v652_v51, %v648_v37 }
  0x93   : > { %1305 = vmatprep.subr.bf16.mxu1 %v1304_v61 }
  0x94   : > { %v654_v55 = vadd.s32 %v652_v51, %v649_v38  ;;  %vm657_vm2 = vcmp.lt.s32.totalorder %v653_v58, 40  ;;  %v1892_v51 = vsub.s32 0, %v648_v37 }
  0x95   : > { %1177 = vmatmul.mubr.f32.vlgmr.msra.gmra.mrb[0].mxu0 %v1822_v39 }
  0x96   : > { %1179 = vmatprep.mubr.f32.mxu0 %v1825_v40  ;;  %1307 = vmatpush3.bf16.msra.mxu1 %v1304_v61  ;;  %vm658_vm0 = vcmp.lt.s32.totalorder %v654_v55, 40 }
  0x99   : > { %1180 = vmatmul.mubr.f32.gmra.mrb[2].mxu0 %v1830_v41 }
  0x9a   : > { %1182 = vmatprep.mubr.f32.mxu0 %v1833_v42 }
  0x9d   : > { %1183 = vmatmul.mubr.f32.gmra.mrb[4].mxu0 %v1838_v43 }
  0x9e   : > { %1185 = vmatprep.mubr.f32.mxu0 %v1841_v44 }
  0xa1   : > { %1186 = vmatmul.mubr.f32.gmra.mrb[6].mxu0 %v1846_v45 }
  0xa2   : > { %1188 = vmatprep.mubr.f32.mxu0 %v1849_v46 }
  0xa5   : > { %1189 = vmatmul.mubr.f32.gmra.mrb[8].mxu0 %v1854_v47 }
  0xa6   : > { %1191 = vmatprep.mubr.f32.mxu0 %v1857_v48 }
  0xa9   : > { %1192 = vmatmul.mubr.f32.gmra.mrb[10].mxu0 %v1862_v49 }
 0x168   : > { %v1178_v63 = vpop.f32.mrb[0].mxu0 }
 0x169   : > { %v433_v0 = vadd.f32 %v1178_v63, %v1079_v62  ;;  %v427_v1 = vpop.f32.mrb[1].mxu0 }
 0x16a   : > { %v428_v2 = vadd.f32 %v1079_v62, %v427_v1 }
 0x16c   : > { %1407 = vtanh.f32 %v428_v2  ;;  %v1181_v3 = vpop.f32.mrb[2].mxu0 }
 0x16d   : > { %1409 = vtanh.f32 %v433_v0  ;;  %v443_v4 = vadd.f32 %v1181_v3, %v1079_v62  ;;  %v437_v5 = vpop.f32.mrb[3].mxu0 }
 0x16e   : > { %v438_v6 = vadd.f32 %v1079_v62, %v437_v5 }
 0x170   : > { %1411 = vtanh.f32 %v438_v6  ;;  %v1184_v7 = vpop.f32.mrb[4].mxu0 }
 0x171   : > { %1413 = vtanh.f32 %v443_v4  ;;  %v453_v8 = vadd.f32 %v1184_v7, %v1079_v62  ;;  %v447_v9 = vpop.f32.mrb[5].mxu0 }
 0x172   : > { %v448_v10 = vadd.f32 %v1079_v62, %v447_v9 }
 0x174   : > { %1415 = vtanh.f32 %v448_v10  ;;  %v1187_v12 = vpop.f32.mrb[6].mxu0 }
 0x175   : > { %1417 = vtanh.f32 %v453_v8  ;;  %v463_v13 = vadd.f32 %v1187_v12, %v1079_v62  ;;  %v457_v14 = vpop.f32.mrb[7].mxu0 }
 0x176   : > { %v1408_v15 = vpop.eup %1407  ;;  %v458_v16 = vadd.f32 %v1079_v62, %v457_v14 }
 0x177   : > { %v1410_v17 = vpop.eup %1409  ;;  %1226 = vmatprep.mubr.f32.mxu1 %v1408_v15 }
 0x178   : > { %1419 = vtanh.f32 %v458_v16  ;;  %v1190_v18 = vpop.f32.mrb[8].mxu0  ;;  %1227 = vmatmul.mubr.f32.vlgmr.msra.gmra.mrb[0].mxu1 %v1410_v17 }
 0x179   : > { %1421 = vtanh.f32 %v463_v13  ;;  %v473_v19 = vadd.f32 %v1190_v18, %v1079_v62  ;;  %v467_v20 = vpop.f32.mrb[9].mxu0 }
 0x17a   : > { %v1412_v21 = vpop.eup %1411  ;;  %v468_v22 = vadd.f32 %v1079_v62, %v467_v20 }
 0x17b   : > { %v1414_v23 = vpop.eup %1413  ;;  %1229 = vmatprep.mubr.f32.mxu1 %v1412_v21 }
 0x17c   : > { %1423 = vtanh.f32 %v468_v22  ;;  %v1193_v24 = vpop.f32.mrb[10].mxu0  ;;  %1230 = vmatmul.mubr.f32.gmra.mrb[2].mxu1 %v1414_v23 }
 0x17d   : > { %1425 = vtanh.f32 %v473_v19  ;;  %v483_v25 = vadd.f32 %v1193_v24, %v1079_v62  ;;  %v477_v26 = vpop.f32.mrb[11].mxu0 }
 0x17e   : > { %v1416_v27 = vpop.eup %1415  ;;  %v478_v28 = vadd.f32 %v1079_v62, %v477_v26 }
 0x17f   : > { %v1418_v29 = vpop.eup %1417  ;;  %1232 = vmatprep.mubr.f32.mxu1 %v1416_v27 }
 0x180   : > { %1427 = vtanh.f32 %v478_v28  ;;  %1233 = vmatmul.mubr.f32.gmra.mrb[4].mxu1 %v1418_v29 }
 0x181   : > { %1429 = vtanh.f32 %v483_v25 }
 0x182   : > { %v1420_v30 = vpop.eup %1419 }
 0x183   : > { %v1422_v31 = vpop.eup %1421  ;;  %1235 = vmatprep.mubr.f32.mxu1 %v1420_v30 }
 0x184   : > { %1236 = vmatmul.mubr.f32.gmra.mrb[6].mxu1 %v1422_v31 }
 0x186   : > { %v1424_v32 = vpop.eup %1423 }
 0x187   : > { %v1426_v33 = vpop.eup %1425  ;;  %1238 = vmatprep.mubr.f32.mxu1 %v1424_v32 }
 0x188   : > { %1239 = vmatmul.mubr.f32.gmra.mrb[8].mxu1 %v1426_v33 }
 0x18a   : > { %v1428_v34 = vpop.eup %1427 }
 0x18b   : > { %v1430_v35 = vpop.eup %1429  ;;  %1241 = vmatprep.mubr.f32.mxu1 %v1428_v34 }
 0x18c   : > { %1242 = vmatmul.mubr.f32.gmra.mrb[10].mxu1 %v1430_v35 }
 0x24b   : > { %v1228_v53 = vpop.f32.mrb[0].mxu1 }
 0x24c   : > { %v587_v57 = vpop.f32.mrb[1].mxu1  ;;  %v593_v60 = vadd.f32 %v1228_v53, %v1080_v54 }
 0x24d   : > { %v588_v61 = vadd.f32 %v1080_v54, %v587_v57 }
 0x24e   : > { %v662_v2 = vsel %vm658_vm0, %v593_v60, -1e+30 }
 0x24f   : > { %v1231_v62 = vpop.f32.mrb[2].mxu1  ;;  %v661_v4 = vsel %vm657_vm2, %v588_v61, -1e+30 }
 0x250   : > { %v603_v63 = vadd.f32 %v1231_v62, %v1080_v54  ;;  %v597_v0 = vpop.f32.mrb[3].mxu1 }
 0x251   : > { %v598_v1 = vadd.f32 %v1080_v54, %v597_v0 }
 0x252   : > { %v664_v3 = vsel %vm660_vm1, %v603_v63, -1e+30 }
 0x253   : > { %v674_v5 = vmax.f32 %v662_v2, %v664_v3  ;;  %v663_v6 = vsel %vm659_vm3, %v598_v1, -1e+30  ;;  %v1234_v7 = vpop.f32.mrb[4].mxu1 }
 0x254   : > { %v673_v8 = vmax.f32 %v661_v4, %v663_v6  ;;  %v607_v9 = vpop.f32.mrb[5].mxu1  ;;  %v613_v12 = vadd.f32 %v1234_v7, %v1080_v54 }
 0x255   : > { %v608_v13 = vadd.f32 %v1080_v54, %v607_v9 }
 0x256   : > { %v675_v10 = vmax.f32 %v673_v8, %v674_v5  ;;  %v1877_v20 = vsel %vm658_vm0, %v613_v12, -1e+30  ;;  %v701_v12 = vld [vmem:[#allocation2 + $0x1] sm:$0x1] }
 0x257   : > { %v1237_v14 = vpop.f32.mrb[6].mxu1  ;;  %v1883_v22 = vsel %vm657_vm2, %v608_v13, -1e+30 }
 0x258   : > { %v676_v15 = vrot.slane %v675_v10, 4  ;;  %v623_v16 = vadd.f32 %v1237_v14, %v1080_v54  ;;  %v617_v17 = vpop.f32.mrb[7].mxu1 }
 0x259   : > { %v618_v18 = vadd.f32 %v1080_v54, %v617_v17 }
 0x25a   : > { %v677_v19 = vmax.f32 %v675_v10, %v676_v15  ;;  %v1880_v21 = vsel %vm660_vm1, %v623_v16, -1e+30 }
 0x25b   : > { %v683_v23 = vmax.f32 %v1877_v20, %v1880_v21  ;;  %v1888_v24 = vsel %vm659_vm3, %v618_v18, -1e+30  ;;  %v1240_v25 = vpop.f32.mrb[8].mxu1 }
 0x25c   : > { %v678_v26 = vrot.slane %v677_v19, 2  ;;  %v682_v27 = vmax.f32 %v1883_v22, %v1888_v24  ;;  %v627_v28 = vpop.f32.mrb[9].mxu1  ;;  %v633_v31 = vadd.f32 %v1240_v25, %v1080_v54 }
 0x25d   : > { %v628_v32 = vadd.f32 %v1080_v54, %v627_v28 }
 0x25e   : > { %v679_v29 = vmax.f32 %v677_v19, %v678_v26  ;;  %v684_v30 = vmax.f32 %v682_v27, %v683_v23  ;;  %v1895_v60 = vsel %vm658_vm0, %v633_v31, -1e+30 }
 0x25f   : > { %v1243_v33 = vpop.f32.mrb[10].mxu1  ;;  %v1901_v62 = vsel %vm657_vm2, %v628_v32, -1e+30 }
 0x260   : > { %v680_v34 = vrot.slane %v679_v29, 1  ;;  %v685_v35 = vrot.slane %v684_v30, 4  ;;  %v643_v36 = vadd.f32 %v1243_v33, %v1080_v54  ;;  %v637_v38 = vpop.f32.mrb[11].mxu1 }
 0x261   : > { %v638_v52 = vadd.f32 %v1080_v54, %v637_v38 }
 0x262   : > { %v681_v53 = vmax.f32 %v679_v29, %v680_v34  ;;  %v686_v57 = vmax.f32 %v684_v30, %v685_v35  ;;  %v1898_v61 = vsel %vm660_vm1, %v643_v36, -1e+30  ;;  %v1916_v30 = vld [vmem:[#allocation2 + $0x2] sm:$0x1] }
 0x263   : > { %v692_v63 = vmax.f32 %v1895_v60, %v1898_v61  ;;  %v1906_v0 = vsel %vm659_vm3, %v638_v52, -1e+30 }
 0x264   : > { %v703_v37 = vmax.f32 %v700_v50, %v681_v53  ;;  %v687_v1 = vrot.slane %v686_v57, 2  ;;  %v691_v54 = vmax.f32 %v1901_v62, %v1906_v0 }
 0x266   : > { %v721_v55 = vrot.slane %v703_v37, %v1892_v51  ;;  %910 = vst [vmem:[#allocation2] sm:$0x1] %v703_v37  ;;  %v688_v56 = vmax.f32 %v686_v57, %v687_v1  ;;  %v693_v5 = vmax.f32 %v691_v54, %v692_v63  ;;  %v706_v59 = vsub.f32 %v700_v50, %v703_v37 }
 0x268   : > { %v733_v7 = vsub.f32 %v661_v4, %v721_v55  ;;  %v734_v58 = vsub.f32 %v662_v2, %v721_v55  ;;  %v735_v8 = vsub.f32 %v663_v6, %v721_v55  ;;  %v736_v9 = vsub.f32 %v664_v3, %v721_v55 }
 0x269   : > { %v689_v10 = vrot.slane %v688_v56, 1  ;;  %v694_v13 = vrot.slane %v693_v5, 4  ;;  %v709_v26 = vmul.f32 1.442695, %v706_v59 }
 0x26a   : > { %v745_v14 = vmul.f32 1.442695, %v733_v7  ;;  %v747_v15 = vmul.f32 1.442695, %v734_v58  ;;  %v749_v16 = vmul.f32 1.442695, %v735_v8 }
 0x26b   : > { %v751_v17 = vmul.f32 1.442695, %v736_v9  ;;  %v690_v18 = vmax.f32 %v688_v56, %v689_v10  ;;  %v695_v19 = vmax.f32 %v693_v5, %v694_v13  ;;  %v781_v9 = vld [vmem:[#allocation3] sm:$0x1]  ;;  %v820_v10 = vld [vmem:[#allocation4] sm:$0x1] }
 0x26c   : > { %1431 = vpow2.f32 %v745_v14 }
 0x26d   : > { %1433 = vpow2.f32 %v747_v15  ;;  %v704_v23 = vmax.f32 %v701_v12, %v690_v18  ;;  %v696_v25 = vrot.slane %v695_v19, 2 }
 0x26e   : > { %1435 = vpow2.f32 %v749_v16 }
 0x26f   : > { %1437 = vpow2.f32 %v751_v17  ;;  %v725_v2 = vrot.slane %v704_v23, %v1892_v51  ;;  %911 = vst [vmem:[#allocation2 + $0x1] sm:$0x1] %v704_v23  ;;  %v697_v3 = vmax.f32 %v695_v19, %v696_v25  ;;  %v707_v36 = vsub.f32 %v701_v12, %v704_v23 }
 0x270   : > { %1439 = vpow2.f32 %v709_v26 }
 0x271   : > { %v737_v4 = vsub.f32 %v1883_v22, %v725_v2  ;;  %v738_v6 = vsub.f32 %v1877_v20, %v725_v2  ;;  %v739_v27 = vsub.f32 %v1888_v24, %v725_v2  ;;  %v740_v28 = vsub.f32 %v1880_v21, %v725_v2 }
 0x272   : > { %v698_v29 = vrot.slane %v697_v3, 1  ;;  %v711_v37 = vmul.f32 1.442695, %v707_v36 }
 0x273   : > { %v753_v31 = vmul.f32 1.442695, %v737_v4  ;;  %v755_v32 = vmul.f32 1.442695, %v738_v6  ;;  %v757_v33 = vmul.f32 1.442695, %v739_v27 }
 0x274   : > { %v759_v34 = vmul.f32 1.442695, %v740_v28  ;;  %v699_v35 = vmax.f32 %v697_v3, %v698_v29 }
 0x275   : > { %1441 = vpow2.f32 %v753_v31 }
 0x276   : > { %v1432_v38 = vpop.eup %1431  ;;  %1443 = vpow2.f32 %v755_v32  ;;  %v1919_v22 = vmax.f32 %v1916_v30, %v699_v35 }
 0x277   : > { %v1434_v20 = vpop.eup %1433  ;;  %v769_v24 = vmul.f32 %v1432_v38, %v1818_v11  ;;  %1445 = vpow2.f32 %v757_v33 }
 0x278   : > { %v1436_v21 = vpop.eup %1435  ;;  %v770_v50 = vmul.f32 %v1434_v20, %v1822_v39  ;;  %v787_v52 = vadd.f32 %v1434_v20, %v1432_v38  ;;  %1447 = vpow2.f32 %v759_v34  ;;  %912 = vst [vmem:[#allocation2 + $0x2] sm:$0x1] %v1919_v22  ;;  %v1928_v1 = vrot.slane %v1919_v22, %v1892_v51 }
 0x279   : > { %v1438_v53 = vpop.eup %1437  ;;  %v771_v57 = vmul.f32 %v1436_v21, %v1825_v40  ;;  %v865_v63 = vmul.f32 %v769_v24, %v1818_v11  ;;  %1449 = vpow2.f32 %v711_v37  ;;  %v859_v37 = vld [vmem:[#allocation5] sm:$0x1] }
 0x27a   : > { %v772_v54 = vmul.f32 %v1438_v53, %v1830_v41  ;;  %v788_v55 = vadd.f32 %v1436_v21, %v787_v52  ;;  %v826_v56 = vadd.f32 %v770_v50, %v769_v24  ;;  %v866_v5 = vmul.f32 %v770_v50, %v1822_v39  ;;  %v1440_v8 = vpop.eup %1439 }
 0x27b   : > { %v741_v7 = vsub.f32 %v1901_v62, %v1928_v1  ;;  %v742_v58 = vsub.f32 %v1895_v60, %v1928_v1  ;;  %v867_v51 = vmul.f32 %v771_v57, %v1825_v40  ;;  %v743_v59 = vsub.f32 %v1906_v0, %v1928_v1 }
 0x27c   : > { %v789_v11 = vadd.f32 %v1438_v53, %v788_v55  ;;  %v827_v12 = vadd.f32 %v826_v56, %v771_v57  ;;  %v877_v13 = vadd.f32 %v866_v5, %v865_v63  ;;  %v744_v39 = vsub.f32 %v1898_v61, %v1928_v1 }
 0x27d   : > { %v761_v14 = vmul.f32 1.442695, %v741_v7  ;;  %v868_v60 = vmul.f32 %v772_v54, %v1830_v41  ;;  %v784_v18 = vmul.f32 %v1440_v8, %v781_v9  ;;  %v823_v19 = vmul.f32 %v1440_v8, %v820_v10 }
 0x27e   : > { %v790_v62 = vrot.slane %v789_v11, 4  ;;  %v828_v15 = vadd.f32 %v827_v12, %v772_v54  ;;  %v878_v16 = vadd.f32 %v877_v13, %v867_v51  ;;  %v763_v23 = vmul.f32 1.442695, %v742_v58 }
 0x27f   : > { %v1442_v17 = vpop.eup %1441  ;;  %1451 = vpow2.f32 %v761_v14  ;;  %v765_v6 = vmul.f32 1.442695, %v743_v59  ;;  %v767_v5 = vmul.f32 1.442695, %v744_v39  ;;  %v862_v10 = vmul.f32 %v1440_v8, %v859_v37 }
 0x280   : > { %v1444_v40 = vpop.eup %1443  ;;  %v791_v25 = vadd.f32 %v790_v62, %v789_v11  ;;  %v829_v26 = vrot.slane %v828_v15, 4  ;;  %v879_v2 = vadd.f32 %v878_v16, %v868_v60  ;;  %v773_v0 = vmul.f32 %v1442_v17, %v1833_v42 }
 0x281   : > { %v1446_v3 = vpop.eup %1445  ;;  %v774_v61 = vmul.f32 %v1444_v40, %v1838_v43  ;;  %v796_v4 = vadd.f32 %v1444_v40, %v1442_v17  ;;  %1453 = vpow2.f32 %v763_v23  ;;  %v708_v60 = vsub.f32 %v1916_v30, %v1919_v22 }
 0x282   : > { %v1448_v27 = vpop.eup %1447  ;;  %v792_v41 = vrot.slane %v791_v25, 2  ;;  %v830_v28 = vadd.f32 %v829_v26, %v828_v15  ;;  %v880_v29 = vrot.slane %v879_v2, 4  ;;  %v775_v31 = vmul.f32 %v1446_v3, %v1841_v44 }
 0x283   : > { %v776_v32 = vmul.f32 %v1448_v27, %v1846_v45  ;;  %v797_v33 = vadd.f32 %v1446_v3, %v796_v4  ;;  %v835_v34 = vadd.f32 %v774_v61, %v773_v0  ;;  %v869_v35 = vmul.f32 %v773_v0, %v1833_v42  ;;  %v1950_v55 = vpop.eup %1449 }
 0x284   : > { %v793_v36 = vadd.f32 %v792_v41, %v791_v25  ;;  %v831_v38 = vrot.slane %v830_v28, 2  ;;  %v881_v20 = vadd.f32 %v880_v29, %v879_v2  ;;  %v870_v24 = vmul.f32 %v774_v61, %v1838_v43  ;;  %v782_v2 = vld [vmem:[#allocation3 + $0x1] sm:$0x1] }
 0x285   : > { %v798_v21 = vadd.f32 %v1448_v27, %v797_v33  ;;  %v836_v50 = vadd.f32 %v835_v34, %v775_v31  ;;  %v871_v52 = vmul.f32 %v775_v31, %v1841_v44  ;;  %v872_v53 = vmul.f32 %v776_v32, %v1846_v45 }
 0x286   : > { %v794_v57 = vrot.slane %v793_v36, 1  ;;  %v832_v63 = vadd.f32 %v831_v38, %v830_v28  ;;  %v882_v1 = vrot.slane %v881_v20, 2  ;;  %v886_v54 = vadd.f32 %v870_v24, %v869_v35  ;;  %v860_v24 = vld [vmem:[#allocation5 + $0x1] sm:$0x1] }
 0x287   : > { %v799_v56 = vrot.slane %v798_v21, 4  ;;  %v837_v42 = vadd.f32 %v836_v50, %v776_v32  ;;  %1455 = vpow2.f32 %v765_v6  ;;  %v713_v22 = vmul.f32 1.442695, %v708_v60 }
 0x288   : > { %v795_v7 = vadd.f32 %v794_v57, %v793_v36  ;;  %v833_v58 = vrot.slane %v832_v63, 1  ;;  %v883_v43 = vadd.f32 %v882_v1, %v881_v20  ;;  %v887_v9 = vadd.f32 %v886_v54, %v871_v52 }
 0x289   : > { %v1452_v11 = vpop.eup %1451  ;;  %v800_v44 = vadd.f32 %v799_v56, %v798_v21  ;;  %v838_v12 = vrot.slane %v837_v42, 4  ;;  %1457 = vpow2.f32 %v767_v5  ;;  %v785_v28 = vmul.f32 %v1950_v55, %v782_v2 }
 0x28a   : > { %v814_v45 = vadd.f32 %v795_v7, %v784_v18  ;;  %v834_v51 = vadd.f32 %v833_v58, %v832_v63  ;;  %v884_v13 = vrot.slane %v883_v43, 1  ;;  %v888_v59 = vadd.f32 %v887_v9, %v872_v53 }
 0x28b   : > { %v1454_v14 = vpop.eup %1453  ;;  %v801_v62 = vrot.slane %v800_v44, 2  ;;  %v839_v15 = vadd.f32 %v838_v12, %v837_v42  ;;  %v777_v39 = vmul.f32 %v1452_v11, %v1849_v46  ;;  %1459 = vpow2.f32 %v713_v22 }
 0x28c   : > { %817 = vst [vmem:[#allocation3] sm:$0x1] %v814_v45  ;;  %v853_v16 = vadd.f32 %v834_v51, %v823_v19  ;;  %v885_v17 = vadd.f32 %v884_v13, %v883_v43  ;;  %v889_v23 = vrot.slane %v888_v59, 4  ;;  %v778_v8 = vmul.f32 %v1454_v14, %v1854_v47  ;;  %v821_v19 = vld [vmem:[#allocation4 + $0x1] sm:$0x1] }
 0x28d   : > { %v802_v40 = vadd.f32 %v801_v62, %v800_v44  ;;  %v840_v25 = vrot.slane %v839_v15, 2  ;;  %v805_v18 = vadd.f32 %v1454_v14, %v1452_v11  ;;  %v873_v61 = vmul.f32 %v777_v39, %v1849_v46  ;;  %v783_v45 = vld [vmem:[#allocation3 + $0x2] sm:$0x1] }
 0x28e   : > { %856 = vst [vmem:[#allocation4] sm:$0x1] %v853_v16  ;;  %v904_v26 = vadd.f32 %v885_v17, %v862_v10  ;;  %v890_v0 = vadd.f32 %v889_v23, %v888_v59  ;;  %v844_v3 = vadd.f32 %v778_v8, %v777_v39  ;;  %v874_v6 = vmul.f32 %v778_v8, %v1854_v47  ;;  %v822_v59 = vld [vmem:[#allocation4 + $0x2] sm:$0x1]  ;;  %v861_v23 = vld [vmem:[#allocation5 + $0x2] sm:$0x1] }
 0x28f   : > { %v803_v4 = vrot.slane %v802_v40, 1  ;;  %v841_v30 = vadd.f32 %v840_v25, %v839_v15  ;;  %v824_v38 = vmul.f32 %v1950_v55, %v821_v19  ;;  %v863_v63 = vmul.f32 %v1950_v55, %v860_v24 }
 0x290   : > { %907 = vst [vmem:[#allocation5] sm:$0x1] %v904_v26  ;;  %v891_v27 = vrot.slane %v890_v0, 2  ;;  %v895_v32 = vadd.f32 %v874_v6, %v873_v61 }
 0x291   : > { %v1456_v41 = vpop.eup %1455  ;;  %v804_v29 = vadd.f32 %v803_v4, %v802_v40  ;;  %v842_v31 = vrot.slane %v841_v30, 1 }
 0x292   : > { %v892_v33 = vadd.f32 %v891_v27, %v890_v0  ;;  %v779_v34 = vmul.f32 %v1456_v41, %v1857_v48  ;;  %v806_v35 = vadd.f32 %v1456_v41, %v805_v18 }
 0x293   : > { %v1458_v36 = vpop.eup %1457  ;;  %v815_v46 = vadd.f32 %v804_v29, %v785_v28  ;;  %v843_v20 = vadd.f32 %v842_v31, %v841_v30  ;;  %v917_v2 = vld [vmem:[#allocation3] sm:$0x1] (!%p1082_p10) }
 0x294   : > { %v893_v47 = vrot.slane %v892_v33, 1  ;;  %v780_v21 = vmul.f32 %v1458_v36, %v1862_v49  ;;  %v807_v50 = vadd.f32 %v1458_v36, %v806_v35  ;;  %v845_v52 = vadd.f32 %v844_v3, %v779_v34 }
 0x295   : > { %818 = vst [vmem:[#allocation3 + $0x1] sm:$0x1] %v815_v46  ;;  %v854_v53 = vadd.f32 %v843_v20, %v824_v38  ;;  %v875_v57 = vmul.f32 %v779_v34, %v1857_v48  ;;  %v1460_v48 = vpop.eup %1459  ;;  %1461 = vrcp.f32 (!%p1082_p10), %v917_v2  ;;  %v923_v61 = vld [vmem:[#allocation4] sm:$0x1] (!%p1082_p10) }
 0x296   : > { %v894_v37 = vadd.f32 %v893_v47, %v892_v33  ;;  %v808_v1 = vrot.slane %v807_v50, 4  ;;  %v846_v54 = vadd.f32 %v845_v52, %v780_v21  ;;  %v876_v56 = vmul.f32 %v780_v21, %v1862_v49 }
 0x297   : > { %857 = vst [vmem:[#allocation4 + $0x1] sm:$0x1] %v854_v53  ;;  %v896_v42 = vadd.f32 %v895_v32, %v875_v57  ;;  %v786_v62 = vmul.f32 %v1460_v48, %v783_v45  ;;  %v825_v16 = vmul.f32 %v1460_v48, %v822_v59  ;;  %v864_v25 = vmul.f32 %v1460_v48, %v861_v23  ;;  %v929_v4 = vld [vmem:[#allocation5] sm:$0x1] (!%p1082_p10) }
 0x298   : > { %v905_v5 = vadd.f32 %v894_v37, %v863_v63  ;;  %v809_v7 = vadd.f32 %v808_v1, %v807_v50  ;;  %v847_v58 = vrot.slane %v846_v54, 4 }
 0x299   : > { %v897_v43 = vadd.f32 %v896_v42, %v876_v56 }
 0x29a   : > { %908 = vst [vmem:[#allocation5 + $0x1] sm:$0x1] %v905_v5  ;;  %v810_v9 = vrot.slane %v809_v7, 2  ;;  %v848_v11 = vadd.f32 %v847_v58, %v846_v54 }
 0x29b   : > { %v898_v10 = vrot.slane %v897_v43, 4 }
 0x29c   : > { %v811_v44 = vadd.f32 %v810_v9, %v809_v7  ;;  %v849_v12 = vrot.slane %v848_v11, 2  ;;  %v918_v0 = vld [vmem:[#allocation3 + $0x1] sm:$0x1] (!%p1082_p10) }
 0x29d   : > { %v899_v55 = vadd.f32 %v898_v10, %v897_v43  ;;  %1463 = vrcp.f32 (!%p1082_p10), %v918_v0 }
 0x29e   : > { %v812_v51 = vrot.slane %v811_v44, 1  ;;  %v850_v13 = vadd.f32 %v849_v12, %v848_v11  ;;  %v924_v30 = vld [vmem:[#allocation4 + $0x1] sm:$0x1] (!%p1082_p10) }
 0x29f   : > { %v900_v14 = vrot.slane %v899_v55, 2  ;;  %v1462_v6 = vpop.eup (!%p1082_p10), %1461 }
 0x2a0   : > { %v813_v49 = vadd.f32 %v812_v51, %v811_v44  ;;  %v851_v15 = vrot.slane %v850_v13, 1  ;;  %v926_v28 = vmul.f32 (!%p1082_p10), %v1462_v6, %v923_v61  ;;  %v932_v29 = vmul.f32 (!%p1082_p10), %v1462_v6, %v929_v4 }
 0x2a1   : > { %v901_v60 = vadd.f32 %v900_v14, %v899_v55  ;;  %v930_v22 = vld [vmem:[#allocation5 + $0x1] sm:$0x1] (!%p1082_p10) }
 0x2a2   : > { %v816_v39 = vadd.f32 %v813_v49, %v786_v62  ;;  %v852_v17 = vadd.f32 %v851_v15, %v850_v13  ;;  %v935_v34 = vmul.f32 (!%p1082_p10), %v926_v28, %v926_v28  ;;  %965 = vst [vmem:[#allocation12] sm:$0x1] (!%p1082_p10), %v926_v28 }
 0x2a3   : > { %v902_v8 = vrot.slane %v901_v60, 1  ;;  %916 = sbr.rel (%p1082_p10) target bundleno = 719 (0x2cf), region = 60 }
 0x2a4   : > { %819 = vst [vmem:[#allocation3 + $0x2] sm:$0x1] %v816_v39  ;;  %v855_v40 = vadd.f32 %v852_v17, %v825_v16  ;;  %v938_v38 = vsub.f32 (!%p1082_p10), %v932_v29, %v935_v34 }
 0x2a5   : > { %v903_v18 = vadd.f32 %v902_v8, %v901_v60 }
 0x2a6   : > { %858 = vst [vmem:[#allocation4 + $0x2] sm:$0x1] %v855_v40  ;;  %v941_v47 = vmax.f32 (!%p1082_p10), %v938_v38, 1e-05 }
 0x2a7   : > { %v906_v26 = vadd.f32 %v903_v18, %v864_v25  ;;  %v1464_v41 = vpop.eup (!%p1082_p10), %1463 }
 0x2a8   : > { %v927_v32 = vmul.f32 (!%p1082_p10), %v1464_v41, %v924_v30  ;;  %v933_v33 = vmul.f32 (!%p1082_p10), %v1464_v41, %v930_v22  ;;  %vm946_vm4 = vcmp.eq.f32.partialorder (!%p1082_p10), %v941_v47, inf  ;;  %v949_v57 = vand.u32 (!%p1082_p10), 2147483648, %v941_v47 }
 0x2a9   : > { %909 = vst [vmem:[#allocation5 + $0x2] sm:$0x1] %v906_v26  ;;  %vm948_vm5 = vcmp.eq.f32.partialorder (!%p1082_p10), %v941_v47, 0.0 }
 0x2aa   : > { %v936_v46 = vmul.f32 %v927_v32, %v927_v32  ;;  %966 = vst [vmem:[#allocation12 + $0x2] sm:$0x1] %v927_v32 }
 0x2ab   : > { %v919_v3 = vld [vmem:[#allocation3 + $0x2] sm:$0x1] }
 0x2ac   : > { %1465 = vrcp.f32 %v919_v3  ;;  %v939_v24 = vsub.f32 %v933_v33, %v936_v46 }
 0x2ad   : > { %v925_v19 = vld [vmem:[#allocation4 + $0x2] sm:$0x1]  ;;  %1467 = vrsqrt.f32 %v941_v47 }
 0x2ae   : > { %v942_v50 = vmax.f32 %v939_v24, 1e-05 }
 0x2b0   : > { %v931_v27 = vld [vmem:[#allocation5 + $0x2] sm:$0x1]  ;;  %1469 = vrsqrt.f32 %v942_v50  ;;  %vm953_vm6 = vcmp.eq.f32.partialorder %v942_v50, inf  ;;  %v956_v1 = vand.u32 2147483648, %v942_v50  ;;  %vm955_vm7 = vcmp.eq.f32.partialorder %v942_v50, 0.0 }
 0x2b6   : > { %v1466_v31 = vpop.eup %1465 }
 0x2b7   : > { %v928_v35 = vmul.f32 %v1466_v31, %v925_v19  ;;  %v934_v36 = vmul.f32 %v1466_v31, %v931_v27  ;;  %v1468_v53 = vpop.eup %1467 }
 0x2b8   : > { %v945_v37 = vmul.f32 %v1468_v53, %v941_v47 }
 0x2b9   : > { %v937_v20 = vmul.f32 %v928_v35, %v928_v35  ;;  %967 = vst [vmem:[#allocation12 + $0x4] sm:$0x1] %v928_v35 }
 0x2ba   : > { %v1470_v63 = vpop.eup %1469  ;;  %v947_v5 = vsel %vm946_vm4, %v941_v47, %v945_v37 }
 0x2bb   : > { %v940_v21 = vsub.f32 %v934_v36, %v937_v20  ;;  %v952_v56 = vmul.f32 %v1470_v63, %v942_v50  ;;  %v950_v58 = vsel %vm948_vm5, %v949_v57, %v947_v5 }
 0x2bc   : > { %968 = vst [vmem:[#allocation12 + $0x1] sm:$0x1] %v950_v58 }
 0x2bd   : > { %v943_v52 = vmax.f32 %v940_v21, 1e-05  ;;  %v954_v43 = vsel %vm953_vm6, %v942_v50, %v952_v56 }
 0x2be   : > { %v957_v9 = vsel %vm955_vm7, %v956_v1, %v954_v43 }
 0x2bf   : > { %1471 = vrsqrt.f32 %v943_v52  ;;  %vm960_vm8 = vcmp.eq.f32.partialorder %v943_v52, inf  ;;  %v963_v42 = vand.u32 2147483648, %v943_v52  ;;  %vm962_vm9 = vcmp.eq.f32.partialorder %v943_v52, 0.0  ;;  %969 = vst [vmem:[#allocation12 + $0x3] sm:$0x1] %v957_v9 }
 0x2c9   : > { %v1472_v54 = vpop.eup %1471 }
 0x2ca   : > { %v959_v7 = vmul.f32 %v1472_v54, %v943_v52 }
 0x2cc   : > { %v961_v11 = vsel %vm960_vm8, %v943_v52, %v959_v7 }
 0x2cd   : > { %v964_v10 = vsel %vm962_vm9, %v963_v42, %v961_v11 }
 0x2ce   : > { %970 = vst [vmem:[#allocation12 + $0x5] sm:$0x1] %v964_v10 }
 0x2cf PF: > { %s2033_s21 = sadd.s32 4294967295, %s1613_s23   ;;  %s1627_s18 = smov [#allocation12]  }
 0x2d0   : > { %p1968_p1 = scmp.eq.s32.totalorder %s2033_s21, 1  ;;  %s980_s28 = sshll.u32 %s1627_s18, 4  ;;  %s981_s28 = int_to_ptr.vmem [resolvable:$true] %s980_s28 }
 0x2d1   : > { %s1529_s13 = scalar_lea.vmem %s981_s28, 96  ;;  %p1536_p7 = scmp.lt.s32.totalorder %s981_s28, %s981_s28 }
 0x2d2   : > { %p1530_p2 = scmp.ne.s32.totalorder %s981_s28, %s1529_s13  ;;  %p1537_p9 = scmp.lt.s32.totalorder %s1529_s13, %s1529_s13 }
 0x2d4   : > { %p1531_p4 = pnand %p1530_p2, %p1968_p1  ;;  %p1538_p11 = por %p1537_p9, %p1536_p7 }
 0x2d6   : > { %p1532_p6 = pneg %p1531_p4 }
 0x2d8   : > { %p1539_p13 = pnand %p1538_p11, %p1532_p6 }
 0x2da   : > { %1542 = shalt.err (!%p1539_p13)
}
 0x2db   : > { %s1543_s12 = scalar_lea.hbm %s2017_s5, 96 }
 0x2dc   : > { %p1544_p0 = scmp.ne.s32.totalorder %s2017_s5, %s1543_s12  ;;  %p1549_p5 = scmp.lt.u32.totalorder %s1543_s12, %s2017_s5 }
 0x2de   : > { %p1545_p12 = pnand %p1544_p0, %p1968_p1 }
 0x2e0   : > { %p1546_p3 = pneg %p1545_p12 }
 0x2e2   : > { %p1551_p8 = pnand %p1549_p5, %p1546_p3 }
 0x2e4   : > { %1554 = shalt.err (!%p1551_p8)
}
 0x2e5   : > { %s1628_s9 = smov 32   ;;  %s1629_s24 = smov 2  }
 0x2e6   : > { %1328 = dma.vmem_to_hbm [thread:$0]  (%p1968_p1), %s981_s28, 96, %s2017_s5, [#allocation8], %s1628_s9, %s1628_s9, %s1629_s24  }
 0x2e7   : > { %1588 = dma.done.wait (%p1968_p1), [#allocation8], 96  }
 0x2e8   : > { %1590 = vsyncadd (%p1968_p1), [#allocation8], 4294967200 }
 0x2e9 PF: > { %s20_s23 = sadd.s32 1, %s1613_s23   ;;  %s2035_s18 = smov %s1597_s19 }
 0x2ea   : > { %p17_p10 = scmp.ge.s32.totalorder %s20_s23, 4   ;;  %s2036_s19 = smov %s1601_s20 }
 0x2eb   : > { %s2037_s20 = smov %s1718_s6  ;;  %s2038_s21 = smov %s1609_s22 }
 0x2ec   : > { %s2039_s22 = smov %s2041_s25  ;;  %19 = sbr.rel (!%p17_p10) target bundleno = 6 (0x6), region = 99 }
 0x2f3   :  { %996 = vsyncpa [#allocation7], 1 }
 0x2f4   :  { %998 = vsyncpa [#allocation7 + $0x1], 1 }
 0x2f5   :  { %999 = vsyncpa [#allocation10], 1 }
 0x2f6   :  { %1000 = vsyncpa [#allocation8], 1 }
 0x2f7   :  { %1002 = vsyncpa [#allocation8 + $0x1], 1 }

</bundles_post_ra>
